<compile_context>
chip_gen: v7x
topology: tpu7x:2x2x1
jax: 0.10.0
libtpu: 0.0.40
codegen_flags: <defaults>
</compile_context>

<pallas_src>
import functools

import numpy as np
import jax
import jax.numpy as jnp
from jax.experimental import pallas as pl
from jax.experimental.pallas import tpu as pltpu

LOG2 = float(np.log(2.0))


# ----------------------------------------------------------------------------
# In-kernel math helpers.
# ----------------------------------------------------------------------------
def _log1p_poly(t):
    """log(1 + t) for t in [0, 1] with no EUP op.

    log1p(t) = 2*atanh(z), z = t/(t+2) in [0, 1/3].  1/(t+2) comes from a chord
    seed (exact at t=0 and t=1, rel err <= 4.2%) plus two Newton steps (VPU
    only); the odd atanh series is truncated after z^9.  Abs error < 5e-6.
    """
    d = t + 2.0
    r = 0.5 - t * (1.0 / 6.0)          # seed
    r = r * (2.0 - d * r)              # Newton -> ~1.8e-3 rel
    r = r * (2.0 - d * r)              # Newton -> ~3e-6 rel
    z = t * r
    z2 = z * z
    p = 2.0 / 9.0
    p = p * z2 + 2.0 / 7.0
    p = p * z2 + 2.0 / 5.0
    p = p * z2 + 2.0 / 3.0
    p = p * z2 + 2.0
    return p * z


def _ssp(h):
    """Shifted softplus log(1 + exp(h)) - log 2 with a single EUP op (the exp)."""
    t = jnp.exp(-jnp.abs(h))           # EUP; t in (0, 1]
    return jnp.maximum(h, 0.0) + _log1p_poly(t) - LOG2


# ----------------------------------------------------------------------------
# Pallas kernel: fused 3-layer multi-head SSP MLP over a block of rows.
# ----------------------------------------------------------------------------
def _backflow_kernel(x_ref, w1_ref, w2_ref, w3_ref, b_ref, out_ref, *, c1, c2):
    b = b_ref[...]                     # (1, c1 + c2 + c3) f32, packed biases
    b1 = b[:, :c1]
    b2 = b[:, c1:c1 + c2]
    b3 = b[:, c1 + c2:]

    # Layer 1: all heads at once (weights lane-concatenated in the wrapper).
    h = jnp.dot(x_ref[...], w1_ref[...],
                preferred_element_type=jnp.float32) + b1
    h = _ssp(h).astype(w2_ref.dtype)
    # Layers 2 and 3: block-diagonal packed weights keep heads independent.
    h = jnp.dot(h, w2_ref[...], preferred_element_type=jnp.float32) + b2
    h = _ssp(h).astype(w3_ref.dtype)
    y = jnp.dot(h, w3_ref[...], preferred_element_type=jnp.float32) + b3
    out_ref[...] = y.astype(out_ref.dtype)


# ----------------------------------------------------------------------------
# Host-side packing / blocking helpers.
# ----------------------------------------------------------------------------
def _round_up(x, m):
    return (x + m - 1) // m * m


def _pick_row_block(rows, requested, *, min_steps=4, align=16):
    """Row block: multiple of 16 (bf16 sublane tile), clipped to the problem,
    shrunk until the parallel grid has >= min_steps steps (v7x: 2 TCs need
    >= 4 steps to keep per-core double-buffering)."""
    rb = _round_up(max(1, min(int(requested), rows)), align)
    while rb > align and pl.cdiv(rows, rb) < min_steps:
        rb = _round_up(rb // 2, align)
    return rb


def _pack_heads(params, compute_dtype):
    """Pack per-head weights so the whole multi-head stack is 3 dense matmuls.

    Layer 1: weights concatenated along the output (lane) axis -> shared-input
    matmul, xs never replicated.  Layers 2/3: block-diagonal (the off-diagonal
    zeros are a few kB and are fetched once per call, not per grid step).
    Biases of all layers/heads are packed into a single (1, C) row."""
    def bdiag(ws):
        a, b = ws[0].shape
        out = jnp.zeros((len(ws) * a, len(ws) * b), jnp.float32)
        for q, w in enumerate(ws):
            out = out.at[q * a:(q + 1) * a, q * b:(q + 1) * b].set(w)
        return out

    w1 = jnp.concatenate([p['w1'] for p in params], axis=1)
    w2 = bdiag([p['w2'] for p in params])
    w3 = bdiag([p['w3'] for p in params])
    bias = jnp.concatenate(
        [jnp.concatenate([p[f'b{l}'] for p in params]) for l in (1, 2, 3)]
    ).reshape(1, -1).astype(jnp.float32)
    return (w1.astype(compute_dtype), w2.astype(compute_dtype),
            w3.astype(compute_dtype), bias)


def backflow_pallas(xs, params, *, row_block=256, min_grid_steps=4,
                    compute_dtype=jnp.bfloat16, vmem_limit_bytes=None,
                    deep_buffer_x=False):
    """Backflow forward (multi_head=True): xs (*, N, D) -> (*, N_bf, N, O)."""
    n_bf = len(params)
    d_in = params[0]['w1'].shape[0]
    n_orb = params[0]['w3'].shape[1]
    assert xs.shape[-1] == d_in

    lead = xs.shape[:-1]                      # (*, N)
    rows = int(np.prod(lead))
    w1, w2, w3, bias = _pack_heads(params, compute_dtype)
    c1, c2, c3 = w1.shape[1], w2.shape[1], w3.shape[1]

    rb = _pick_row_block(rows, row_block, min_steps=min_grid_steps)
    rows_p = _round_up(rows, rb)
    x = xs.reshape(rows, d_in)
    if rows_p != rows:
        x = jnp.pad(x, ((0, rows_p - rows), (0, 0)))
    x = x.astype(compute_dtype)

    x_spec_kwargs = {}
    if deep_buffer_x:
        # Only if profiling shows the xs DMA is still exposed on this chip.
        x_spec_kwargs['pipeline_mode'] = pl.Buffered(3)

    cp = {'dimension_semantics': ('parallel',)}
    if vmem_limit_bytes is not None:
        cp['vmem_limit_bytes'] = int(vmem_limit_bytes)

    kern = functools.partial(_backflow_kernel, c1=c1, c2=c2)
    out = pl.pallas_call(
        kern,
        out_shape=jax.ShapeDtypeStruct((rows_p, c3), jnp.float32),
        grid=(rows_p // rb,),
        in_specs=[
            pl.BlockSpec((rb, d_in), lambda r: (r, 0), **x_spec_kwargs),
            # Constant block index => weights/biases are fetched once, not per step.
            pl.BlockSpec((d_in, c1), lambda r: (0, 0)),
            pl.BlockSpec((c1, c2), lambda r: (0, 0)),
            pl.BlockSpec((c2, c3), lambda r: (0, 0)),
            pl.BlockSpec((1, c1 + c2 + c3), lambda r: (0, 0)),
        ],
        out_specs=pl.BlockSpec((rb, c3), lambda r: (r, 0)),
        compiler_params=pltpu.CompilerParams(**cp),
    )(x, w1, w2, w3, bias)

    out = out[:rows].reshape(lead + (n_bf, n_orb))
    return jnp.moveaxis(out, -2, -3)          # == torch.stack(..., dim=1)


# ----------------------------------------------------------------------------
# Pure-JAX reference mirroring the torch forward, and parameter init.
# ----------------------------------------------------------------------------
def backflow_ref(xs, params, quant_dtype=None):
    """Reference.  If quant_dtype is given, matmul operands (x, weights and the
    activations feeding each matmul) are rounded to it exactly as the kernel
    does; matmuls themselves stay f32 (HIGHEST precision)."""
    def q(a):
        return (a.astype(quant_dtype).astype(jnp.float32)
                if quant_dtype is not None else a)

    def ssp(a):
        return jax.nn.softplus(a) - LOG2

    hi = jax.lax.Precision.HIGHEST
    x = q(xs)
    outs = []
    for p in params:
        h = ssp(jnp.dot(x, q(p['w1']), precision=hi) + p['b1'])
        h = ssp(jnp.dot(q(h), q(p['w2']), precision=hi) + p['b2'])
        outs.append(jnp.dot(q(h), q(p['w3']), precision=hi) + p['b3'])
    return jnp.stack(outs, axis=-3)


def _log_widths(d_in, d_out, n_layers):
    # deepqmc-style 'log' hidden-layer schedule: log-spaced widths d_in -> d_out.
    return [int(round(d_in ** (1 - k / n_layers) * d_out ** (k / n_layers)))
            for k in range(n_layers + 1)]


def init_backflow_params(key, embedding_dim, n_orbitals, n_backflows, n_layers=3):
    dims = _log_widths(embedding_dim, n_orbitals, n_layers)
    params = []
    for _ in range(n_backflows):
        head = {}
        for l, (din, dout) in enumerate(zip(dims[:-1], dims[1:]), start=1):
            key, kw, kb = jax.random.split(key, 3)
            head[f'w{l}'] = (jax.random.normal(kw, (din, dout), jnp.float32)
                             / np.sqrt(din))
            head[f'b{l}'] = 0.1 * jax.random.normal(kb, (dout,), jnp.float32)
        params.append(head)
    return params


if __name__ == "__main__":
    # Small shapes: rows = B*N = 64 -> row_block 16, 4-step parallel grid
    # (exercises the padding-free multi-step path and the megacore minimum).
    B, N, D = 4, 16, 32               # batch, electrons, embedding dim
    n_orbitals, n_backflows = 8, 3    # -> per-head widths [32, 20, 13, 8]

    key = jax.random.PRNGKey(0)
    kx, kp = jax.random.split(key)
    xs = jax.random.normal(kx, (B, N, D), jnp.float32)
    params = init_backflow_params(kp, D, n_orbitals, n_backflows)

    out = backflow_pallas(xs, params)
    out = jax.block_until_ready(out)
    assert out.shape == (B, n_backflows, N, n_orbitals)

    # Tight check vs. a reference with identical bf16 operand rounding
    # (tolerance covers f32 accumulation order, the VPU log1p poly (<5e-6) and
    # rare 1-ulp re-rounding of intermediate activations).
    ref_q = jax.block_until_ready(backflow_ref(xs, params, quant_dtype=jnp.bfloat16))
    np.testing.assert_allclose(np.asarray(out), np.asarray(ref_q),
                               rtol=1e-2, atol=5e-3)

    # Independent sanity check vs. the full-f32 reference: confirms the bf16
    # quantization itself stays small (review correctness concern).
    ref_f32 = jax.block_until_ready(backflow_ref(xs, params))
    np.testing.assert_allclose(np.asarray(out), np.asarray(ref_f32),
                               rtol=5e-2, atol=2.5e-2)

    print("KERNEL_OK")
</pallas_src>

<mosaic_0001>
module attributes {stable_mosaic.version = 11 : i64} {
  func.func @_backflow_kernel(%arg0: i32, %arg1: memref<16x32xbf16, #tpu.memory_space<vmem>>, %arg2: memref<32x60xbf16, #tpu.memory_space<vmem>>, %arg3: memref<60x39xbf16, #tpu.memory_space<vmem>>, %arg4: memref<39x24xbf16, #tpu.memory_space<vmem>>, %arg5: memref<1x123xf32, #tpu.memory_space<vmem>>, %arg6: memref<16x24xf32, #tpu.memory_space<vmem>>) attributes {dimension_semantics = [#tpu.dimension_semantics<parallel>], iteration_bounds = array<i64: 4>, scalar_prefetch = 0 : i64, scratch_operands = 0 : i64, tpu.core_type = #tpu.core_type<tc>, window_params = [{transform_indices = @transform_0, window_bounds = array<i64: 16, 32>}, {pipeline_mode = #tpu.pipeline_mode<synchronous>, transform_indices = @transform_1, window_bounds = array<i64: 32, 60>}, {pipeline_mode = #tpu.pipeline_mode<synchronous>, transform_indices = @transform_2, window_bounds = array<i64: 60, 39>}, {pipeline_mode = #tpu.pipeline_mode<synchronous>, transform_indices = @transform_3, window_bounds = array<i64: 39, 24>}, {pipeline_mode = #tpu.pipeline_mode<synchronous>, transform_indices = @transform_4, window_bounds = array<i64: 1, 123>}, {transform_indices = @transform_5, window_bounds = array<i64: 16, 24>}]} {
    %c0 = arith.constant 0 : index
    %c0_0 = arith.constant 0 : index
    %0 = vector.load %arg5[%c0, %c0_0] : memref<1x123xf32, #tpu.memory_space<vmem>>, vector<1x123xf32>
    %1 = vector.extract_strided_slice %0 {offsets = [0, 0], sizes = [1, 60], strides = [1, 1]} : vector<1x123xf32> to vector<1x60xf32>
    %2 = vector.extract_strided_slice %0 {offsets = [0, 60], sizes = [1, 39], strides = [1, 1]} : vector<1x123xf32> to vector<1x39xf32>
    %3 = vector.extract_strided_slice %0 {offsets = [0, 99], sizes = [1, 24], strides = [1, 1]} : vector<1x123xf32> to vector<1x24xf32>
    %c0_1 = arith.constant 0 : index
    %c0_2 = arith.constant 0 : index
    %4 = vector.load %arg1[%c0_1, %c0_2] : memref<16x32xbf16, #tpu.memory_space<vmem>>, vector<16x32xbf16>
    %c0_3 = arith.constant 0 : index
    %c0_4 = arith.constant 0 : index
    %5 = vector.load %arg2[%c0_3, %c0_4] : memref<32x60xbf16, #tpu.memory_space<vmem>>, vector<32x60xbf16>
    %cst = arith.constant dense<0.000000e+00> : vector<16x60xf32>
    %6 = tpu.matmul %4, %5, %cst {dimension_numbers = #tpu.dot_dimension_numbers<[1], [0], [0], [1], [0, 0, 1, 1], [], []>} : vector<16x32xbf16>, vector<32x60xbf16>, vector<16x60xf32> -> vector<16x60xf32>
    %7 = vector.broadcast %1 : vector<1x60xf32> to vector<16x60xf32>
    %8 = arith.addf %6, %7 : vector<16x60xf32>
    %9 = math.absf %8 : vector<16x60xf32>
    %cst_5 = arith.constant 0.000000e+00 : f32
    %10 = vector.broadcast %cst_5 : f32 to vector<16x60xf32>
    %11 = arith.subf %10, %9 : vector<16x60xf32>
    %12 = math.exp %11 : vector<16x60xf32>
    %cst_6 = arith.constant 0.000000e+00 : f32
    %13 = vector.broadcast %cst_6 : f32 to vector<16x60xf32>
    %14 = arith.maximumf %8, %13 : vector<16x60xf32>
    %cst_7 = arith.constant 2.000000e+00 : f32
    %15 = vector.broadcast %cst_7 : f32 to vector<16x60xf32>
    %16 = arith.addf %12, %15 : vector<16x60xf32>
    %cst_8 = arith.constant 0.166666672 : f32
    %17 = vector.broadcast %cst_8 : f32 to vector<16x60xf32>
    %18 = arith.mulf %12, %17 : vector<16x60xf32>
    %cst_9 = arith.constant 5.000000e-01 : f32
    %19 = vector.broadcast %cst_9 : f32 to vector<16x60xf32>
    %20 = arith.subf %19, %18 : vector<16x60xf32>
    %21 = arith.mulf %16, %20 : vector<16x60xf32>
    %cst_10 = arith.constant 2.000000e+00 : f32
    %22 = vector.broadcast %cst_10 : f32 to vector<16x60xf32>
    %23 = arith.subf %22, %21 : vector<16x60xf32>
    %24 = arith.mulf %20, %23 : vector<16x60xf32>
    %25 = arith.mulf %16, %24 : vector<16x60xf32>
    %cst_11 = arith.constant 2.000000e+00 : f32
    %26 = vector.broadcast %cst_11 : f32 to vector<16x60xf32>
    %27 = arith.subf %26, %25 : vector<16x60xf32>
    %28 = arith.mulf %24, %27 : vector<16x60xf32>
    %29 = arith.mulf %12, %28 : vector<16x60xf32>
    %30 = arith.mulf %29, %29 : vector<16x60xf32>
    %cst_12 = arith.constant 0.222222224 : f32
    %31 = vector.broadcast %cst_12 : f32 to vector<16x60xf32>
    %32 = arith.mulf %31, %30 : vector<16x60xf32>
    %cst_13 = arith.constant 0.285714298 : f32
    %33 = vector.broadcast %cst_13 : f32 to vector<16x60xf32>
    %34 = arith.addf %32, %33 : vector<16x60xf32>
    %35 = arith.mulf %34, %30 : vector<16x60xf32>
    %cst_14 = arith.constant 4.000000e-01 : f32
    %36 = vector.broadcast %cst_14 : f32 to vector<16x60xf32>
    %37 = arith.addf %35, %36 : vector<16x60xf32>
    %38 = arith.mulf %37, %30 : vector<16x60xf32>
    %cst_15 = arith.constant 0.666666686 : f32
    %39 = vector.broadcast %cst_15 : f32 to vector<16x60xf32>
    %40 = arith.addf %38, %39 : vector<16x60xf32>
    %41 = arith.mulf %40, %30 : vector<16x60xf32>
    %cst_16 = arith.constant 2.000000e+00 : f32
    %42 = vector.broadcast %cst_16 : f32 to vector<16x60xf32>
    %43 = arith.addf %41, %42 : vector<16x60xf32>
    %44 = arith.mulf %43, %29 : vector<16x60xf32>
    %45 = arith.addf %14, %44 : vector<16x60xf32>
    %cst_17 = arith.constant 0.693147182 : f32
    %46 = vector.broadcast %cst_17 : f32 to vector<16x60xf32>
    %47 = arith.subf %45, %46 : vector<16x60xf32>
    %48 = arith.truncf %47 : vector<16x60xf32> to vector<16x60xbf16>
    %c0_18 = arith.constant 0 : index
    %c0_19 = arith.constant 0 : index
    %49 = vector.load %arg3[%c0_18, %c0_19] : memref<60x39xbf16, #tpu.memory_space<vmem>>, vector<60x39xbf16>
    %cst_20 = arith.constant dense<0.000000e+00> : vector<16x39xf32>
    %50 = tpu.matmul %48, %49, %cst_20 {dimension_numbers = #tpu.dot_dimension_numbers<[1], [0], [0], [1], [0, 0, 1, 1], [], []>} : vector<16x60xbf16>, vector<60x39xbf16>, vector<16x39xf32> -> vector<16x39xf32>
    %51 = vector.broadcast %2 : vector<1x39xf32> to vector<16x39xf32>
    %52 = arith.addf %50, %51 : vector<16x39xf32>
    %53 = math.absf %52 : vector<16x39xf32>
    %cst_21 = arith.constant 0.000000e+00 : f32
    %54 = vector.broadcast %cst_21 : f32 to vector<16x39xf32>
    %55 = arith.subf %54, %53 : vector<16x39xf32>
    %56 = math.exp %55 : vector<16x39xf32>
    %cst_22 = arith.constant 0.000000e+00 : f32
    %57 = vector.broadcast %cst_22 : f32 to vector<16x39xf32>
    %58 = arith.maximumf %52, %57 : vector<16x39xf32>
    %cst_23 = arith.constant 2.000000e+00 : f32
    %59 = vector.broadcast %cst_23 : f32 to vector<16x39xf32>
    %60 = arith.addf %56, %59 : vector<16x39xf32>
    %cst_24 = arith.constant 0.166666672 : f32
    %61 = vector.broadcast %cst_24 : f32 to vector<16x39xf32>
    %62 = arith.mulf %56, %61 : vector<16x39xf32>
    %cst_25 = arith.constant 5.000000e-01 : f32
    %63 = vector.broadcast %cst_25 : f32 to vector<16x39xf32>
    %64 = arith.subf %63, %62 : vector<16x39xf32>
    %65 = arith.mulf %60, %64 : vector<16x39xf32>
    %cst_26 = arith.constant 2.000000e+00 : f32
    %66 = vector.broadcast %cst_26 : f32 to vector<16x39xf32>
    %67 = arith.subf %66, %65 : vector<16x39xf32>
    %68 = arith.mulf %64, %67 : vector<16x39xf32>
    %69 = arith.mulf %60, %68 : vector<16x39xf32>
    %cst_27 = arith.constant 2.000000e+00 : f32
    %70 = vector.broadcast %cst_27 : f32 to vector<16x39xf32>
    %71 = arith.subf %70, %69 : vector<16x39xf32>
    %72 = arith.mulf %68, %71 : vector<16x39xf32>
    %73 = arith.mulf %56, %72 : vector<16x39xf32>
    %74 = arith.mulf %73, %73 : vector<16x39xf32>
    %cst_28 = arith.constant 0.222222224 : f32
    %75 = vector.broadcast %cst_28 : f32 to vector<16x39xf32>
    %76 = arith.mulf %75, %74 : vector<16x39xf32>
    %cst_29 = arith.constant 0.285714298 : f32
    %77 = vector.broadcast %cst_29 : f32 to vector<16x39xf32>
    %78 = arith.addf %76, %77 : vector<16x39xf32>
    %79 = arith.mulf %78, %74 : vector<16x39xf32>
    %cst_30 = arith.constant 4.000000e-01 : f32
    %80 = vector.broadcast %cst_30 : f32 to vector<16x39xf32>
    %81 = arith.addf %79, %80 : vector<16x39xf32>
    %82 = arith.mulf %81, %74 : vector<16x39xf32>
    %cst_31 = arith.constant 0.666666686 : f32
    %83 = vector.broadcast %cst_31 : f32 to vector<16x39xf32>
    %84 = arith.addf %82, %83 : vector<16x39xf32>
    %85 = arith.mulf %84, %74 : vector<16x39xf32>
    %cst_32 = arith.constant 2.000000e+00 : f32
    %86 = vector.broadcast %cst_32 : f32 to vector<16x39xf32>
    %87 = arith.addf %85, %86 : vector<16x39xf32>
    %88 = arith.mulf %87, %73 : vector<16x39xf32>
    %89 = arith.addf %58, %88 : vector<16x39xf32>
    %cst_33 = arith.constant 0.693147182 : f32
    %90 = vector.broadcast %cst_33 : f32 to vector<16x39xf32>
    %91 = arith.subf %89, %90 : vector<16x39xf32>
    %92 = arith.truncf %91 : vector<16x39xf32> to vector<16x39xbf16>
    %c0_34 = arith.constant 0 : index
    %c0_35 = arith.constant 0 : index
    %93 = vector.load %arg4[%c0_34, %c0_35] : memref<39x24xbf16, #tpu.memory_space<vmem>>, vector<39x24xbf16>
    %cst_36 = arith.constant dense<0.000000e+00> : vector<16x24xf32>
    %94 = tpu.matmul %92, %93, %cst_36 {dimension_numbers = #tpu.dot_dimension_numbers<[1], [0], [0], [1], [0, 0, 1, 1], [], []>} : vector<16x39xbf16>, vector<39x24xbf16>, vector<16x24xf32> -> vector<16x24xf32>
    %95 = vector.broadcast %3 : vector<1x24xf32> to vector<16x24xf32>
    %96 = arith.addf %94, %95 : vector<16x24xf32>
    %c0_37 = arith.constant 0 : index
    %c0_38 = arith.constant 0 : index
    %97 = vector.load %arg6[%c0_37, %c0_38] : memref<16x24xf32, #tpu.memory_space<vmem>>, vector<16x24xf32>
    tpu.vector_store %arg6[%c0_37, %c0_38], %96 {strides = array<i32>} : memref<16x24xf32, #tpu.memory_space<vmem>>, vector<16x24xf32>,
    return
  }
  func.func @transform_0(%arg0: i32) -> (i32, i32) {
    %c0_i32 = arith.constant 0 : i32
    %c0_i32_0 = arith.constant 0 : i32
    return %arg0, %c0_i32 : i32, i32
  }
  func.func @transform_1(%arg0: i32) -> (i32, i32) {
    %c0_i32 = arith.constant 0 : i32
    %c0_i32_0 = arith.constant 0 : i32
    %c0_i32_1 = arith.constant 0 : i32
    return %c0_i32, %c0_i32_0 : i32, i32
  }
  func.func @transform_2(%arg0: i32) -> (i32, i32) {
    %c0_i32 = arith.constant 0 : i32
    %c0_i32_0 = arith.constant 0 : i32
    %c0_i32_1 = arith.constant 0 : i32
    return %c0_i32, %c0_i32_0 : i32, i32
  }
  func.func @transform_3(%arg0: i32) -> (i32, i32) {
    %c0_i32 = arith.constant 0 : i32
    %c0_i32_0 = arith.constant 0 : i32
    %c0_i32_1 = arith.constant 0 : i32
    return %c0_i32, %c0_i32_0 : i32, i32
  }
  func.func @transform_4(%arg0: i32) -> (i32, i32) {
    %c0_i32 = arith.constant 0 : i32
    %c0_i32_0 = arith.constant 0 : i32
    %c0_i32_1 = arith.constant 0 : i32
    return %c0_i32, %c0_i32_0 : i32, i32
  }
  func.func @transform_5(%arg0: i32) -> (i32, i32) {
    %c0_i32 = arith.constant 0 : i32
    %c0_i32_0 = arith.constant 0 : i32
    return %arg0, %c0_i32 : i32, i32
  }
}

</mosaic_0001>

<bundles_post_ra>
// kernel: tpu_custom_call.1
= control target key start
LH: loop header
LB: loop body
LE: loop exit
PB: predicated region body
PF: predicated region fallthrough
CT: control target
= control target key end

     0   :  { %s776_s18 = smov 0   ;;  %s845_s0 = inlined_call_operand.vmem [shape: bf16[64,32], index: 0, kind: input, shape index: {}]   ;;  %s846_s1 = inlined_call_operand.vmem [shape: bf16[32,60], index: 1, kind: input, shape index: {}]   ;;  %s847_s2 = inlined_call_operand.vmem [shape: bf16[60,39], index: 2, kind: input, shape index: {}]   ;;  %s848_s3 = inlined_call_operand.vmem [shape: bf16[39,24], index: 3, kind: input, shape index: {}]   ;;  %s849_s4 = inlined_call_operand.vmem [shape: f32[1,123], index: 4, kind: input, shape index: {}]   ;;  %s850_s5 = inlined_call_operand.vmem [shape: f32[64,24], index: 5, kind: output, shape index: {}]  }
   0x1 LB: > { %s631_s19 = sadd.s32 4294967295, %s739_s18   ;;  %p635_p0 = scmp.ge.s32.totalorder %s739_s18, 1  ;;  %s739_s18 = sphi %s776_s18, %s15_s18  }
   0x2   : > { %p188_p1 = scmp.lt.s32.totalorder %s739_s18, 5 }
   0x4   : > { %p189_p2 = pnand %p635_p0, %p188_p1 }
   0x5   : > { %v715_v0 = vld [vmem:[%s846_s1] sm:$0xff] (!%p189_p2)   ;;  %v741_v1 = vmov (!%p189_p2), 0.0   ;;  %v716_v2 = vld [vmem:[%s846_s1 + $0x8] sm:$0xff] (!%p189_p2)   ;;  %vm742_vm0 = vmmov (!%p189_p2), 0   ;;  %s636_s24 = sshll.u32 (!%p189_p2), %s631_s19, 1  ;;  %vm259_vm1 = vcmask (!%p189_p2), 261120  }
   0x6   : > { %192 = sbr.rel (%p189_p2) target bundleno = 788 (0x314), region = 40  ;;  %672 = vmatprep.subr.bf16.mxu0 (!%p189_p2), %v741_v1  ;;  %680 = vmatprep.subr.bf16.mxu1 (!%p189_p2), %v741_v1  ;;  %p217_p3 = scmp.lt.s32.totalorder (!%p189_p2), %s636_s24, 7  ;;  %v718_v4 = vld [vmem:[%s847_s2] sm:$0xff] (!%p189_p2)   ;;  %v719_v5 = vld [vmem:[%s847_s2 + $0x8] sm:$0xff] (!%p189_p2)   ;;  %v720_v6 = vld [vmem:[%s847_s2 + $0x10] sm:$0xff] (!%p189_p2)   ;;  %vm397_vm2 = vcmask (!%p189_p2), 1045504  }
   0x7   : > { %673 = vmatpush3.bf16.msra.mxu0 (!%p189_p2), %v715_v0  ;;  %676 = vmatprep.mubr.msk.bf16.mxu0 (!%p189_p2), %vm742_vm0, %v741_v1  ;;  %v721_v7 = vld [vmem:[%s847_s2 + $0x18] sm:$0x3f] (!%p189_p2)   ;;  %v821_v9 = vld [vmem:[%s849_s4] ss:$0 sm:$0xff] (!%p189_p2)  ;;  %s743_s14 = smov (!%p189_p2), 68   ;;  %vm393_vm3 = vcmask (!%p189_p2), 490496  }
   0x8   : > { %674 = vmatprep.subr.bf16.mxu0 (!%p189_p2), %v741_v1  ;;  %688 = vmatprep.mubr.msk.bf16.mxu1 (!%p189_p2), %vm742_vm0, %v741_v1  ;;  %v399_v8 = vsel (!%p189_p2), %vm397_vm2, %v721_v7, 0  ;;  %vm524_vm4 = vcmask (!%p189_p2), 1042432   ;;  %vm525_vm5 = vcmask (!%p189_p2), 1043456   ;;  %s745_s22 = smov (!%p189_p2), 29   ;;  %vm520_vm6 = vcmask (!%p189_p2), 318464  }
   0x9   : > { %681 = vmatpush3.bf16.msra.mxu1 (!%p189_p2), %v718_v4  ;;  %390 = vrot.lane.b32.xlu0 (!%p189_p2), %v821_v9, %s743_s14  ;;  %vm572_vm7 = vcmask (!%p189_p2), 195584  }
   0xa   : > { %682 = vmatprep.subr.bf16.mxu1 (!%p189_p2), %v741_v1 }
   0xb   : > { %675 = vmatpush3.bf16.msra.mxu0 (!%p189_p2), %v716_v2 }
   0xc   : > { %692 = vmatprep.subr.bf16.mxu0 (!%p189_p2), %v741_v1 }
   0xd   : > { %s852_s24 = smov (!%p217_p3, %s636_s24), 7  ;;  %683 = vmatpush3.bf16.msra.mxu1 %v719_v5  ;;  %517 = vrot.lane.b32.xlu0 %v821_v9, %s745_s22 }
   0xe   : > { %s637_s25 = sshll.u32 %s852_s24, 2  ;;  %684 = vmatprep.subr.bf16.mxu1 %v741_v1  ;;  %s639_s23 = sshll.u32 %s852_s24, 3 }
   0xf   : > { %s220_s28 = scalar_lea.vmem %s845_s0, %s637_s25  ;;  %s226_s27 = scalar_lea.vmem %s850_s5, %s639_s23 }
  0x10   : > { %v717_v3 = vld [vmem:[%s220_s28] sm:$0xff]  }
  0x11   : > { %677 = vmatmul.mubr.msk.bf16.vlgmr.msra.gmra.mrb[0].mxu0 %vm259_vm1, %v717_v3  ;;  %685 = vmatpush3.bf16.msra.mxu1 %v720_v6 }
  0x12   : > { %698 = vmatprep.mubr.msk.bf16.mxu0 %vm742_vm0, %v741_v1  ;;  %686 = vmatprep.subr.bf16.mxu1 %v741_v1 }
  0x15   : > { %687 = vmatpush3.bf16.msra.mxu1 %v399_v8  ;;  %v722_v8 = vld [vmem:[%s848_s3] sm:$0xff]  }
  0x16   : > { %693 = vmatpush3.bf16.msra.mxu0 %v722_v8 }
  0x17   : > { %694 = vmatprep.subr.bf16.mxu0 %v741_v1 }
  0xe4   : > { %v297_v10 = vpop.f32.mrb[0].mxu0 }
  0xe5   : > { %v298_v11 = vadd.f32 %v821_v9, %v297_v10  ;;  %v678_v12 = vpop.f32.mrb[1].mxu0  ;;  %v723_v10 = vld [vmem:[%s848_s3 + $0x8] sm:$0xff]  }
  0xe6   : > { %v300_v13 = vpop.f32.mrb[2].mxu0  ;;  %695 = vmatpush3.bf16.msra.mxu0 %v723_v10  ;;  %v744_v12 = vmov 65535  }
  0xe7   : > { %v304_v14 = vand.u32 2147483647, %v298_v11  ;;  %v301_v15 = vadd.f32 %v821_v9, %v300_v13  ;;  %v679_v16 = vpop.f32.mrb[3].mxu0  ;;  %v312_v61 = vmax.f32 %v298_v11, 0.0  ;;  %v724_v11 = vld [vmem:[%s848_s3 + $0x10] ss:$0 sps:$4 sm:$0xff]   ;;  %696 = vmatprep.subr.bf16.mxu0 %v741_v1 }
  0xe8   : > { %v526_v13 = vsel %vm524_vm4, 4294967295, %v744_v12  ;;  %v391_v16 = vpop.permute.xlu0 %390 }
  0xe9   : > { %v306_v17 = vsub.f32 0.0, %v304_v14  ;;  %v305_v18 = vand.u32 2147483647, %v301_v15  ;;  %v313_v2 = vmax.f32 %v301_v15, 0.0  ;;  %v527_v14 = vsel %vm525_vm5, %v526_v13, 0 }
  0xea   : > { %v529_v15 = vand.u32 %v724_v11, %v527_v14 }
  0xeb   : > { %v308_v19 = vmul.f32 1.442695, %v306_v17  ;;  %v307_v20 = vsub.f32 0.0, %v305_v18 }
  0xec   : > { %697 = vmatpush3.bf16.msra.mxu0 %v529_v15  ;;  %v518_v14 = vpop.permute.xlu0 %517 }
  0xed   : > { %725 = vpow2.f32 %v308_v19  ;;  %v310_v21 = vmul.f32 1.442695, %v307_v20 }
  0xef   : > { %727 = vpow2.f32 %v310_v21 }
  0xf7   : > { %v726_v22 = vpop.eup %725 }
  0xf8   : > { %v316_v23 = vmul.f32 0.16666667, %v726_v22  ;;  %v314_v25 = vadd.f32 2.0, %v726_v22 }
  0xf9   : > { %v728_v24 = vpop.eup %727 }
  0xfa   : > { %v318_v26 = vsub.f32 0.5, %v316_v23  ;;  %v317_v27 = vmul.f32 0.16666667, %v728_v24  ;;  %v315_v29 = vadd.f32 2.0, %v728_v24 }
  0xfc   : > { %v320_v28 = vmul.f32 %v318_v26, %v314_v25  ;;  %v319_v30 = vsub.f32 0.5, %v317_v27 }
  0xfe   : > { %v322_v31 = vsub.f32 2.0, %v320_v28  ;;  %v321_v32 = vmul.f32 %v319_v30, %v315_v29 }
 0x100   : > { %v324_v33 = vmul.f32 %v322_v31, %v318_v26  ;;  %v323_v34 = vsub.f32 2.0, %v321_v32 }
 0x102   : > { %v326_v35 = vmul.f32 %v324_v33, %v314_v25  ;;  %v325_v36 = vmul.f32 %v323_v34, %v319_v30 }
 0x104   : > { %v328_v37 = vsub.f32 2.0, %v326_v35  ;;  %v327_v38 = vmul.f32 %v325_v36, %v315_v29 }
 0x106   : > { %v330_v39 = vmul.f32 %v328_v37, %v324_v33  ;;  %v329_v40 = vsub.f32 2.0, %v327_v38 }
 0x108   : > { %v332_v41 = vmul.f32 %v726_v22, %v330_v39  ;;  %v331_v42 = vmul.f32 %v329_v40, %v325_v36 }
 0x10a   : > { %v334_v43 = vmul.f32 %v332_v41, %v332_v41  ;;  %v333_v44 = vmul.f32 %v728_v24, %v331_v42 }
 0x10c   : > { %v336_v45 = vmul.f32 0.22222222, %v334_v43  ;;  %v335_v46 = vmul.f32 %v333_v44, %v333_v44 }
 0x10e   : > { %v338_v47 = vadd.f32 0.2857143, %v336_v45  ;;  %v337_v48 = vmul.f32 0.22222222, %v335_v46 }
 0x110   : > { %v340_v49 = vmul.f32 %v338_v47, %v334_v43  ;;  %v339_v50 = vadd.f32 0.2857143, %v337_v48 }
 0x112   : > { %v342_v51 = vadd.f32 0.4, %v340_v49  ;;  %v341_v52 = vmul.f32 %v339_v50, %v335_v46 }
 0x114   : > { %v344_v53 = vmul.f32 %v342_v51, %v334_v43  ;;  %v343_v54 = vadd.f32 0.4, %v341_v52 }
 0x116   : > { %v346_v55 = vadd.f32 0.6666667, %v344_v53  ;;  %v345_v56 = vmul.f32 %v343_v54, %v335_v46 }
 0x118   : > { %v348_v57 = vmul.f32 %v346_v55, %v334_v43  ;;  %v347_v58 = vadd.f32 0.6666667, %v345_v56 }
 0x11a   : > { %v350_v59 = vadd.f32 2.0, %v348_v57  ;;  %v349_v60 = vmul.f32 %v347_v58, %v335_v46 }
 0x11c   : > { %v352_v62 = vmul.f32 %v350_v59, %v332_v41  ;;  %v351_v63 = vadd.f32 2.0, %v349_v60 }
 0x11e   : > { %v354_v0 = vadd.f32 %v352_v62, %v312_v61  ;;  %v353_v3 = vmul.f32 %v351_v63, %v333_v44 }
 0x120   : > { %v355_v4 = vadd.f32 %v353_v3, %v313_v2  ;;  %v645_v5 = vadd.f32 -0.6931472, %v354_v0 }
 0x122   : > { %v646_v6 = vadd.f32 -0.6931472, %v355_v4 }
 0x124   : > { %v358_v7 = vpack.c.bf16 %v646_v6, %v645_v5 }
 0x126   : > { %689 = vmatmul.mubr.msk.bf16.vlgmr.msra.gmra.mrb[0].mxu1 %vm393_vm3, %v358_v7 }
 0x1f9   : > { %v435_v17 = vpop.f32.mrb[0].mxu1 }
 0x1fa   : > { %v436_v18 = vadd.f32 %v435_v17, %v391_v16  ;;  %v690_v19 = vpop.f32.mrb[1].mxu1 }
 0x1fb   : > { %v438_v20 = vpop.f32.mrb[2].mxu1 }
 0x1fc   : > { %v442_v21 = vand.u32 2147483647, %v436_v18  ;;  %v439_v22 = vadd.f32 %v438_v20, %v391_v16  ;;  %v691_v23 = vpop.f32.mrb[3].mxu1  ;;  %v450_v3 = vmax.f32 %v436_v18, 0.0 }
 0x1fe   : > { %v444_v24 = vsub.f32 0.0, %v442_v21  ;;  %v443_v25 = vand.u32 2147483647, %v439_v22  ;;  %v451_v7 = vmax.f32 %v439_v22, 0.0 }
 0x200   : > { %v446_v26 = vmul.f32 1.442695, %v444_v24  ;;  %v445_v27 = vsub.f32 0.0, %v443_v25 }
 0x202   : > { %729 = vpow2.f32 %v446_v26  ;;  %v448_v1 = vmul.f32 1.442695, %v445_v27 }
 0x204   : > { %731 = vpow2.f32 %v448_v1 }
 0x20c   : > { %v730_v28 = vpop.eup %729 }
 0x20d   : > { %v454_v29 = vmul.f32 0.16666667, %v730_v28  ;;  %v452_v31 = vadd.f32 2.0, %v730_v28 }
 0x20e   : > { %v732_v30 = vpop.eup %731 }
 0x20f   : > { %v456_v9 = vsub.f32 0.5, %v454_v29  ;;  %v455_v32 = vmul.f32 0.16666667, %v732_v30  ;;  %v453_v34 = vadd.f32 2.0, %v732_v30 }
 0x211   : > { %v458_v33 = vmul.f32 %v456_v9, %v452_v31  ;;  %v457_v35 = vsub.f32 0.5, %v455_v32 }
 0x213   : > { %v460_v36 = vsub.f32 2.0, %v458_v33  ;;  %v459_v37 = vmul.f32 %v457_v35, %v453_v34 }
 0x215   : > { %v462_v38 = vmul.f32 %v460_v36, %v456_v9  ;;  %v461_v39 = vsub.f32 2.0, %v459_v37 }
 0x217   : > { %v464_v40 = vmul.f32 %v462_v38, %v452_v31  ;;  %v463_v41 = vmul.f32 %v461_v39, %v457_v35 }
 0x219   : > { %v466_v42 = vsub.f32 2.0, %v464_v40  ;;  %v465_v43 = vmul.f32 %v463_v41, %v453_v34 }
 0x21b   : > { %v468_v44 = vmul.f32 %v466_v42, %v462_v38  ;;  %v467_v45 = vsub.f32 2.0, %v465_v43 }
 0x21d   : > { %v470_v46 = vmul.f32 %v730_v28, %v468_v44  ;;  %v469_v47 = vmul.f32 %v467_v45, %v463_v41 }
 0x21f   : > { %v472_v48 = vmul.f32 %v470_v46, %v470_v46  ;;  %v471_v49 = vmul.f32 %v732_v30, %v469_v47 }
 0x221   : > { %v474_v50 = vmul.f32 0.22222222, %v472_v48  ;;  %v473_v51 = vmul.f32 %v471_v49, %v471_v49 }
 0x223   : > { %v476_v52 = vadd.f32 0.2857143, %v474_v50  ;;  %v475_v53 = vmul.f32 0.22222222, %v473_v51 }
 0x225   : > { %v478_v54 = vmul.f32 %v476_v52, %v472_v48  ;;  %v477_v55 = vadd.f32 0.2857143, %v475_v53 }
 0x227   : > { %v480_v56 = vadd.f32 0.4, %v478_v54  ;;  %v479_v57 = vmul.f32 %v477_v55, %v473_v51 }
 0x229   : > { %v482_v58 = vmul.f32 %v480_v56, %v472_v48  ;;  %v481_v59 = vadd.f32 0.4, %v479_v57 }
 0x22b   : > { %v484_v60 = vadd.f32 0.6666667, %v482_v58  ;;  %v483_v61 = vmul.f32 %v481_v59, %v473_v51 }
 0x22d   : > { %v486_v62 = vmul.f32 %v484_v60, %v472_v48  ;;  %v485_v63 = vadd.f32 0.6666667, %v483_v61 }
 0x22f   : > { %v488_v0 = vadd.f32 2.0, %v486_v62  ;;  %v487_v2 = vmul.f32 %v485_v63, %v473_v51 }
 0x231   : > { %v490_v4 = vmul.f32 %v488_v0, %v470_v46  ;;  %v489_v5 = vadd.f32 2.0, %v487_v2 }
 0x233   : > { %v492_v6 = vadd.f32 %v490_v4, %v450_v3  ;;  %v491_v8 = vmul.f32 %v489_v5, %v471_v49 }
 0x235   : > { %v493_v10 = vadd.f32 %v491_v8, %v451_v7  ;;  %v652_v11 = vadd.f32 -0.6931472, %v492_v6 }
 0x237   : > { %v653_v12 = vadd.f32 -0.6931472, %v493_v10 }
 0x239   : > { %v496_v13 = vpack.c.bf16 %v653_v12, %v652_v11 }
 0x23b   : > { %699 = vmatmul.mubr.msk.bf16.vlgmr.msra.gmra.mrb[4].mxu0 %vm520_vm6, %v496_v13 }
 0x30e   : > { %v565_v15 = vpop.f32.mrb[4].mxu0 }
 0x30f   : > { %v566_v16 = vadd.f32 %v565_v15, %v518_v14  ;;  %v700_v17 = vpop.f32.mrb[5].mxu0 }
 0x310   : > { %v568_v18 = vpop.f32.mrb[6].mxu0 }
 0x311   : > { %573 = vst.msk [vmem:[%s226_s27] sm:$0xff] %vm572_vm7, %v566_v16  ;;  %v569_v19 = vadd.f32 %v568_v18, %v518_v14  ;;  %v701_v20 = vpop.f32.mrb[7].mxu0 }
 0x313   : > { %574 = vst.msk [vmem:[%s226_s27 + $0x8] sm:$0xff] %vm572_vm7, %v569_v19 }
 0x314 PF: > { %s15_s18 = sadd.s32 1, %s739_s18  }
 0x315   : > { %p12_p4 = scmp.ge.s32.totalorder %s15_s18, 6  }
 0x317   :  { %14 = sbr.rel (!%p12_p4) target bundleno = 1 (0x1), region = 70 }

</bundles_post_ra>
